<compile_context>
chip_gen: v7x
topology: tpu7x:2x2x1
jax: 0.10.0
libtpu: 0.0.40
codegen_flags: <defaults>
</compile_context>

<pallas_src>
import functools

import jax
import jax.numpy as jnp
from jax.experimental import pallas as pl
from jax.experimental.pallas import tpu as pltpu

LANE = 128    # vreg lane width (last dim)
SUBLANE = 8   # f32 sublane height (second-last dim)


def _round_up(x, m):
    return ((x + m - 1) // m) * m


def _pad_cols(a, to):
    pad = to - a.shape[1]
    return a if pad == 0 else jnp.pad(a, ((0, 0), (0, pad)))


def _pad_rows(a, to):
    pad = to - a.shape[0]
    return a if pad == 0 else jnp.pad(a, ((0, pad), (0, 0)))


def deepnn_kernel(x_ref, w1_ref, b1_ref, w2_ref, b2_ref, w3_ref, b3_ref, o_ref, *, use_bf16):
    mm_dtype = jnp.bfloat16 if use_bf16 else jnp.float32
    # Layer 1: Linear + ReLU (+ Dropout = identity in eval)
    h = jnp.dot(x_ref[...].astype(mm_dtype), w1_ref[...].astype(mm_dtype),
                preferred_element_type=jnp.float32) + b1_ref[...]
    h = jnp.maximum(h, 0.0)
    # Layer 2: Linear + ReLU (+ Dropout = identity in eval)
    h = jnp.dot(h.astype(mm_dtype), w2_ref[...].astype(mm_dtype),
                preferred_element_type=jnp.float32) + b2_ref[...]
    h = jnp.maximum(h, 0.0)
    # Output layer: Linear + Sigmoid (true out_dim lanes only; no 128-padding)
    h = jnp.dot(h.astype(mm_dtype), w3_ref[...].astype(mm_dtype),
                preferred_element_type=jnp.float32) + b3_ref[...]
    o_ref[...] = jax.nn.sigmoid(h).astype(o_ref.dtype)


def prepare_params(params):
    """One-time (offline) prep: pad HIDDEN feature dims to lane multiples.

    Weights are already stored as (in, out) (i.e. PyTorch Linear weight transposed).
    Output dim is deliberately left unpadded. Zero-padded hidden columns/rows produce
    exact zeros through ReLU, so results are bit-identical on the true features.
    """
    w1, b1 = params["w1"], params["b1"]
    w2, b2 = params["w2"], params["b2"]
    w3, b3 = params["w3"], params["b3"]
    h1p = _round_up(w1.shape[1], LANE)
    h2p = _round_up(w2.shape[1], LANE)
    return {
        "w1": _pad_cols(w1, h1p), "b1": _pad_cols(b1, h1p),
        "w2": _pad_cols(_pad_rows(w2, h1p), h2p), "b2": _pad_cols(b2, h2p),
        "w3": _pad_rows(w3, h2p), "b3": b3,
    }


def _choose_batch_tile(B, block_batch):
    tb = min(block_batch, B)
    if tb >= B:
        if B >= 2 * SUBLANE:
            # Split the batch over >= 2 grid steps so both v7x TensorCores get work.
            tb = _round_up(pl.cdiv(B, 2), SUBLANE)
        else:
            return B  # single full-batch block (legal even if B % 8 != 0)
    return min(_round_up(tb, SUBLANE), B)


@functools.partial(jax.jit, static_argnames=("block_batch", "use_bf16"))
def deepnn_forward(x, padded_params, *, block_batch=8192, use_bf16=False):
    """x: (B, input_dim) f32. padded_params: output of prepare_params()."""
    w1, b1 = padded_params["w1"], padded_params["b1"]
    w2, b2 = padded_params["w2"], padded_params["b2"]
    w3, b3 = padded_params["w3"], padded_params["b3"]

    B, in_dim = x.shape
    h1p, h2p, out_dim = w1.shape[1], w2.shape[1], w3.shape[1]

    # --- Batch tiling: no padding / slicing; uneven final block handled by Pallas. ------
    tb = _choose_batch_tile(B, block_batch)
    grid = (pl.cdiv(B, tb),)

    # --- VMEM budget (double-buffered x/out tiles + weights + f32 intermediates). -------
    f32b = 4
    x_tile = tb * in_dim * f32b
    out_tile = tb * out_dim * f32b
    weights_b = (in_dim * h1p + h1p * h2p + h2p * out_dim + h1p + h2p + out_dim) * f32b
    interm_b = 2 * tb * max(h1p, h2p) * f32b
    need = 2 * (x_tile + out_tile) + 2 * weights_b + interm_b
    # 48 MiB cap: safe on v7x (64 MiB per TC), leaves huge headroom on v5e/v6e (128 MiB).
    vmem_limit = int(min(max(2 * need, 8 << 20), 48 << 20))

    # --- Advisory cost estimate for XLA's scheduler. -------------------------------------
    flops = 2 * B * (in_dim * h1p + h1p * h2p + h2p * out_dim)
    transcendentals = B * out_dim  # sigmoid -> exp on the EUP
    bytes_accessed = f32b * (B * in_dim + B * out_dim
                             + in_dim * h1p + h1p * h2p + h2p * out_dim
                             + h1p + h2p + out_dim)
    cost = pl.CostEstimate(flops=flops, transcendentals=transcendentals,
                           bytes_accessed=bytes_accessed)

    return pl.pallas_call(
        functools.partial(deepnn_kernel, use_bf16=use_bf16),
        out_shape=jax.ShapeDtypeStruct((B, out_dim), jnp.float32),
        grid=grid,
        in_specs=[
            pl.BlockSpec((tb, in_dim), lambda i: (i, 0)),   # x: tiled along batch
            pl.BlockSpec((in_dim, h1p), lambda i: (0, 0)),  # w1: VMEM-resident
            pl.BlockSpec((1, h1p), lambda i: (0, 0)),       # b1
            pl.BlockSpec((h1p, h2p), lambda i: (0, 0)),     # w2
            pl.BlockSpec((1, h2p), lambda i: (0, 0)),       # b2
            pl.BlockSpec((h2p, out_dim), lambda i: (0, 0)), # w3 (out_dim unpadded)
            pl.BlockSpec((1, out_dim), lambda i: (0, 0)),   # b3
        ],
        out_specs=pl.BlockSpec((tb, out_dim), lambda i: (i, 0)),
        compiler_params=pltpu.CompilerParams(
            dimension_semantics=("parallel",),
            vmem_limit_bytes=vmem_limit,
        ),
        cost_estimate=cost,
    )(x, w1, b1, w2, b2, w3, b3)


def init_params(key, input_dim, hidden_dims, output_dim):
    """Deterministic init mimicking nn.Linear's uniform(-1/sqrt(fan_in), 1/sqrt(fan_in))."""
    dims = [input_dim] + list(hidden_dims) + [output_dim]
    params = {}
    for i in range(len(dims) - 1):
        fan_in, fan_out = dims[i], dims[i + 1]
        key, kw, kb = jax.random.split(key, 3)
        bound = 1.0 / jnp.sqrt(fan_in)
        # stored transposed relative to PyTorch: (in, out)
        params[f"w{i+1}"] = jax.random.uniform(
            kw, (fan_in, fan_out), jnp.float32, minval=-bound, maxval=bound
        )
        params[f"b{i+1}"] = jax.random.uniform(
            kb, (1, fan_out), jnp.float32, minval=-bound, maxval=bound
        )
    return params


def reference_forward(x, params):
    """Pure-JAX reference of the same forward pass (eval-mode dropout)."""
    h = jnp.maximum(x @ params["w1"] + params["b1"], 0.0)
    h = jnp.maximum(h @ params["w2"] + params["b2"], 0.0)
    return jax.nn.sigmoid(h @ params["w3"] + params["b3"])


if __name__ == "__main__":
    # Small shapes consistent with DeepNN(input_dim=32, hidden_dims=[64, 32], output_dim=16).
    batch, input_dim, hidden_dims, output_dim = 24, 32, (64, 32), 16

    key = jax.random.PRNGKey(0)
    key, kx = jax.random.split(key)
    x = jax.random.normal(kx, (batch, input_dim), jnp.float32)
    params = init_params(key, input_dim, hidden_dims, output_dim)
    padded = prepare_params(params)  # done once, outside the jitted forward

    ref = reference_forward(x, params)

    # Path 1: tiny tile -> multi-step grid (grid=(3,)), batch divides the tile evenly.
    out_small = jax.block_until_ready(deepnn_forward(x, padded, block_batch=8))
    assert out_small.shape == (batch, output_dim)
    assert jnp.allclose(out_small, ref, atol=1e-5, rtol=1e-5), "mismatch (block_batch=8)"

    # Path 2: default large tile -> batch split into 2 grid steps with an uneven final
    # block (exercises Pallas boundary masking; no x padding / output slicing in wrapper).
    out_big = jax.block_until_ready(deepnn_forward(x, padded))
    assert out_big.shape == (batch, output_dim)
    assert jnp.allclose(out_big, ref, atol=1e-5, rtol=1e-5), "mismatch (default block_batch)"

    print("KERNEL_OK")
</pallas_src>

<mosaic_0001>
module attributes {stable_mosaic.version = 11 : i64} {
  func.func @deepnn_kernel(%arg0: i32, %arg1: memref<8x32xf32, #tpu.memory_space<vmem>>, %arg2: memref<32x128xf32, #tpu.memory_space<vmem>>, %arg3: memref<1x128xf32, #tpu.memory_space<vmem>>, %arg4: memref<128x128xf32, #tpu.memory_space<vmem>>, %arg5: memref<1x128xf32, #tpu.memory_space<vmem>>, %arg6: memref<128x16xf32, #tpu.memory_space<vmem>>, %arg7: memref<1x16xf32, #tpu.memory_space<vmem>>, %arg8: memref<8x16xf32, #tpu.memory_space<vmem>>) attributes {dimension_semantics = [#tpu.dimension_semantics<parallel>], iteration_bounds = array<i64: 3>, scalar_prefetch = 0 : i64, scratch_operands = 0 : i64, tpu.core_type = #tpu.core_type<tc>, window_params = [{transform_indices = @transform_0, window_bounds = array<i64: 8, 32>}, {pipeline_mode = #tpu.pipeline_mode<synchronous>, transform_indices = @transform_1, window_bounds = array<i64: 32, 128>}, {pipeline_mode = #tpu.pipeline_mode<synchronous>, transform_indices = @transform_2, window_bounds = array<i64: 1, 128>}, {pipeline_mode = #tpu.pipeline_mode<synchronous>, transform_indices = @transform_3, window_bounds = array<i64: 128, 128>}, {pipeline_mode = #tpu.pipeline_mode<synchronous>, transform_indices = @transform_4, window_bounds = array<i64: 1, 128>}, {pipeline_mode = #tpu.pipeline_mode<synchronous>, transform_indices = @transform_5, window_bounds = array<i64: 128, 16>}, {pipeline_mode = #tpu.pipeline_mode<synchronous>, transform_indices = @transform_6, window_bounds = array<i64: 1, 16>}, {transform_indices = @transform_7, window_bounds = array<i64: 8, 16>}]} {
    %c0 = arith.constant 0 : index
    %c0_0 = arith.constant 0 : index
    %0 = vector.load %arg1[%c0, %c0_0] : memref<8x32xf32, #tpu.memory_space<vmem>>, vector<8x32xf32>
    %c0_1 = arith.constant 0 : index
    %c0_2 = arith.constant 0 : index
    %1 = vector.load %arg2[%c0_1, %c0_2] : memref<32x128xf32, #tpu.memory_space<vmem>>, vector<32x128xf32>
    %cst = arith.constant dense<0.000000e+00> : vector<8x128xf32>
    %2 = tpu.matmul %0, %1, %cst {dimension_numbers = #tpu.dot_dimension_numbers<[1], [0], [0], [1], [0, 0, 1, 1], [], []>} : vector<8x32xf32>, vector<32x128xf32>, vector<8x128xf32> -> vector<8x128xf32>
    %c0_3 = arith.constant 0 : index
    %c0_4 = arith.constant 0 : index
    %3 = vector.load %arg3[%c0_3, %c0_4] : memref<1x128xf32, #tpu.memory_space<vmem>>, vector<1x128xf32>
    %4 = vector.broadcast %3 : vector<1x128xf32> to vector<8x128xf32>
    %5 = arith.addf %2, %4 : vector<8x128xf32>
    %cst_5 = arith.constant 0.000000e+00 : f32
    %6 = vector.broadcast %cst_5 : f32 to vector<8x128xf32>
    %7 = arith.maximumf %5, %6 : vector<8x128xf32>
    %c0_6 = arith.constant 0 : index
    %c0_7 = arith.constant 0 : index
    %8 = vector.load %arg4[%c0_6, %c0_7] : memref<128x128xf32, #tpu.memory_space<vmem>>, vector<128x128xf32>
    %cst_8 = arith.constant dense<0.000000e+00> : vector<8x128xf32>
    %9 = tpu.matmul %7, %8, %cst_8 {dimension_numbers = #tpu.dot_dimension_numbers<[1], [0], [0], [1], [0, 0, 1, 1], [], []>} : vector<8x128xf32>, vector<128x128xf32>, vector<8x128xf32> -> vector<8x128xf32>
    %c0_9 = arith.constant 0 : index
    %c0_10 = arith.constant 0 : index
    %10 = vector.load %arg5[%c0_9, %c0_10] : memref<1x128xf32, #tpu.memory_space<vmem>>, vector<1x128xf32>
    %11 = vector.broadcast %10 : vector<1x128xf32> to vector<8x128xf32>
    %12 = arith.addf %9, %11 : vector<8x128xf32>
    %cst_11 = arith.constant 0.000000e+00 : f32
    %13 = vector.broadcast %cst_11 : f32 to vector<8x128xf32>
    %14 = arith.maximumf %12, %13 : vector<8x128xf32>
    %c0_12 = arith.constant 0 : index
    %c0_13 = arith.constant 0 : index
    %15 = vector.load %arg6[%c0_12, %c0_13] : memref<128x16xf32, #tpu.memory_space<vmem>>, vector<128x16xf32>
    %cst_14 = arith.constant dense<0.000000e+00> : vector<8x16xf32>
    %16 = tpu.matmul %14, %15, %cst_14 {dimension_numbers = #tpu.dot_dimension_numbers<[1], [0], [0], [1], [0, 0, 1, 1], [], []>} : vector<8x128xf32>, vector<128x16xf32>, vector<8x16xf32> -> vector<8x16xf32>
    %c0_15 = arith.constant 0 : index
    %c0_16 = arith.constant 0 : index
    %17 = vector.load %arg7[%c0_15, %c0_16] : memref<1x16xf32, #tpu.memory_space<vmem>>, vector<1x16xf32>
    %18 = vector.broadcast %17 : vector<1x16xf32> to vector<8x16xf32>
    %19 = arith.addf %16, %18 : vector<8x16xf32>
    %20 = arith.negf %19 : vector<8x16xf32>
    %21 = math.exp %20 : vector<8x16xf32>
    %cst_17 = arith.constant 1.000000e+00 : f32
    %22 = vector.broadcast %cst_17 : f32 to vector<8x16xf32>
    %23 = arith.addf %22, %21 : vector<8x16xf32>
    %24 = arith.divf %22, %23 : vector<8x16xf32>
    %c0_18 = arith.constant 0 : index
    %c0_19 = arith.constant 0 : index
    %25 = vector.load %arg8[%c0_18, %c0_19] : memref<8x16xf32, #tpu.memory_space<vmem>>, vector<8x16xf32>
    tpu.vector_store %arg8[%c0_18, %c0_19], %24 {strides = array<i32>} : memref<8x16xf32, #tpu.memory_space<vmem>>, vector<8x16xf32>,
    return
  }
  func.func @transform_0(%arg0: i32) -> (i32, i32) {
    %c0_i32 = arith.constant 0 : i32
    %c0_i32_0 = arith.constant 0 : i32
    return %arg0, %c0_i32 : i32, i32
  }
  func.func @transform_1(%arg0: i32) -> (i32, i32) {
    %c0_i32 = arith.constant 0 : i32
    %c0_i32_0 = arith.constant 0 : i32
    %c0_i32_1 = arith.constant 0 : i32
    return %c0_i32, %c0_i32_0 : i32, i32
  }
  func.func @transform_2(%arg0: i32) -> (i32, i32) {
    %c0_i32 = arith.constant 0 : i32
    %c0_i32_0 = arith.constant 0 : i32
    %c0_i32_1 = arith.constant 0 : i32
    return %c0_i32, %c0_i32_0 : i32, i32
  }
  func.func @transform_3(%arg0: i32) -> (i32, i32) {
    %c0_i32 = arith.constant 0 : i32
    %c0_i32_0 = arith.constant 0 : i32
    %c0_i32_1 = arith.constant 0 : i32
    return %c0_i32, %c0_i32_0 : i32, i32
  }
  func.func @transform_4(%arg0: i32) -> (i32, i32) {
    %c0_i32 = arith.constant 0 : i32
    %c0_i32_0 = arith.constant 0 : i32
    %c0_i32_1 = arith.constant 0 : i32
    return %c0_i32, %c0_i32_0 : i32, i32
  }
  func.func @transform_5(%arg0: i32) -> (i32, i32) {
    %c0_i32 = arith.constant 0 : i32
    %c0_i32_0 = arith.constant 0 : i32
    %c0_i32_1 = arith.constant 0 : i32
    return %c0_i32, %c0_i32_0 : i32, i32
  }
  func.func @transform_6(%arg0: i32) -> (i32, i32) {
    %c0_i32 = arith.constant 0 : i32
    %c0_i32_0 = arith.constant 0 : i32
    %c0_i32_1 = arith.constant 0 : i32
    return %c0_i32, %c0_i32_0 : i32, i32
  }
  func.func @transform_7(%arg0: i32) -> (i32, i32) {
    %c0_i32 = arith.constant 0 : i32
    %c0_i32_0 = arith.constant 0 : i32
    return %arg0, %c0_i32 : i32, i32
  }
}

</mosaic_0001>

<bundles_post_ra>
// kernel: deepnn_forward.1
= control target key start
LH: loop header
LB: loop body
LE: loop exit
PB: predicated region body
PF: predicated region fallthrough
CT: control target
= control target key end

     0   :  { %12 = vsyncpa [#allocation3], 0  ;;  %s1343_s0 = inlined_call_operand.hbm [shape: f32[24,32], index: 0, kind: input, shape index: {}]   ;;  %s1344_s1 = inlined_call_operand.vmem [shape: f32[32,128], index: 1, kind: input, shape index: {}]   ;;  %s1345_s2 = inlined_call_operand.vmem [shape: f32[1,128], index: 2, kind: input, shape index: {}]   ;;  %s1346_s3 = inlined_call_operand.vmem [shape: f32[128,128], index: 3, kind: input, shape index: {}]   ;;  %s1347_s4 = inlined_call_operand.vmem [shape: f32[1,128], index: 4, kind: input, shape index: {}]   ;;  %s1348_s5 = inlined_call_operand.vmem [shape: f32[128,16], index: 5, kind: input, shape index: {}]   ;;  %s1349_s6 = inlined_call_operand.hbm [shape: f32[1,16], index: 6, kind: input, shape index: {}]   ;;  %s1350_s7 = inlined_call_operand.vmem [shape: f32[24,16], index: 7, kind: output, shape index: {}]  }
   0x1   :  { %14 = vsyncpa [#allocation3 + $0x1], 0 }
   0x2   :  { %15 = vsyncpa [#allocation5], 0  ;;  %s1055_s24 = smov 0   ;;  %s1057_s25 = smov 0  }
   0x3   :  { %s1059_s26 = smov 0   ;;  %s1061_s27 = smov 0  }
   0x4 LB: > { %s1074_s28 = sadd.s32 4294967295, %s1008_s27   ;;  %p41_p0 = scmp.ne.s32.totalorder %s1000_s25, %s996_s24  ;;  %s1008_s27 = sphi %s1061_s27, %s1368_s27   ;;  %s1004_s26 = sphi %s1059_s26, %s1367_s26   ;;  %s1000_s25 = sphi %s1057_s25, %s1366_s25   ;;  %s996_s24 = sphi %s1055_s24, %s1365_s24  }
   0x5   : > { %p1351_p1 = scmp.eq.s32.totalorder %s1074_s28, 0  ;;  %p665_p2 = scmp.ge.s32.totalorder %s1008_s27, 1 }
   0x6   : > { %p204_p3 = scmp.lt.s32.totalorder %s1008_s27, 4  ;;  %s1010_s8 = smov [#allocation4]  }
   0x7   : > { %p1082_p4 = por %p1351_p1, %p41_p0  ;;  %s232_s9 = sshll.u32 %s1010_s8, 4  ;;  %s233_s9 = int_to_ptr.vmem [resolvable:$true] %s232_s9 }
   0x8   : > { %p1086_p5 = pnand %p665_p2, %p204_p3  ;;  %s1093_s10 = sadd.s32 1, %s1008_s27  }
   0x9   : > { %s1354_s29 = scalar_select %p1082_p4, 1, 0 }
   0xa   : > { %s1355_s30 = scalar_select %p1086_p5, 1, 0 }
   0xb   : > { %p861_p6 = pneg %p1086_p5  ;;  %s25_s12 = ssub.s32 %s1008_s27, %s1093_s10 }
   0xc   : > { %p1103_p8 = scmp.eq.s32.totalorder %s25_s12, 0  ;;  %s28_s14 = sadd.s32 1, %s1004_s26 }
   0xd   : > { %p1097_p7 = pnand %p861_p6, %p1351_p1  ;;  %s912_s17 = scalar_lea.hbm %s1349_s6, 16 }
   0xe   : > { %s1357_s13 = scalar_select %p1103_p8, 1, 0 }
   0xf   : > { %p913_p10 = scmp.ne.s32.totalorder %s1349_s6, %s912_s17  ;;  %p914_p11 = pneg %p1097_p7 }
  0x10   : > { %p919_p0 = scmp.lt.u32.totalorder %s912_s17, %s1349_s6 }
  0x11   : > { %p915_p12 = pnand %p914_p11, %p913_p10 }
  0x13   : > { %p916_p13 = pneg %p915_p12 }
  0x15   : > { %p921_p2 = pnand %p919_p0, %p916_p13 }
  0x17   : > { %924 = shalt.err (!%p921_p2)
}
  0x18   : > { %s925_s22 = scalar_lea.vmem %s233_s9, 16  ;;  %s932_s23 = scalar_lea.vmem %s233_s9, 32 }
  0x19   : > { %p926_p3 = scmp.ne.s32.totalorder %s233_s9, %s925_s22  ;;  %p933_p9 = scmp.lt.s32.totalorder %s233_s9, %s233_s9 }
  0x1a   : > { %p934_p4 = scmp.lt.s32.totalorder %s932_s23, %s925_s22 }
  0x1b   : > { %p928_p6 = pnand %p926_p3, %p914_p11 }
  0x1c   : > { %p935_p5 = por %p934_p4, %p933_p9 }
  0x1d   : > { %p929_p1 = pneg %p928_p6 }
  0x1f   : > { %p936_p8 = pnand %p935_p5, %p929_p1 }
  0x21   : > { %939 = shalt.err (!%p936_p8)
}
  0x22   : > { %864 = dma.hbm_to_vmem [thread:$0]  (!%p1097_p7), %s1349_s6, 16, %s233_s9, [#allocation5]  }
  0x23   : > { %p1358_p10 = scmp.ne.s32.totalorder %s1357_s13, 0  ;;  %p36_p4 = scmp.eq.s32.totalorder %s1008_s27, 0 }
  0x24   : > { %p870_p1 = scmp.lt.s32.totalorder %s1008_s27, 3  ;;  %s243_s15 = sand.u32 1, %s1004_s26  }
  0x25   : > { %s1129_s12 = scalar_select %p1358_p10, %s1004_s26, %s28_s14  }
  0x26   : > { %s669_s16 = sshll.u32 %s1008_s27, 7  ;;  %p1359_p5 = scmp.ne.s32.totalorder %s1004_s26, %s1000_s25 }
  0x27   : > { %s668_s11 = sshll.u32 %s243_s15, 3  ;;  %s1141_s19 = scalar_lea.hbm %s1343_s0, %s669_s16 }
  0x28   : > { %p37_p8 = por %p36_p4, %p1359_p5  ;;  %s247_s13 = scalar_lea.vmem [#allocation2], %s668_s11 }
  0x29   : > { %s254_s27 = sshll.u32 %s247_s13, 4  ;;  %s244_s14 = scalar_lea.sflag [#allocation3], %s243_s15  ;;  %s1147_s27 = int_to_ptr.vmem [resolvable:$true] %s254_s27 }
  0x2a   : > { %p1143_p7 = pnand %p870_p1, %p37_p8  ;;  %s940_s20 = scalar_lea.hbm %s1141_s19, 128 }
  0x2b   : > { %p941_p9 = scmp.ne.s32.totalorder %s1141_s19, %s940_s20  ;;  %s945_s23 = scalar_lea.hbm %s1343_s0, 384 }
  0x2c   : > { %p942_p11 = pneg %p1143_p7  ;;  %p946_p0 = scmp.lt.u32.totalorder %s1141_s19, %s1343_s0 }
  0x2d   : > { %p947_p2 = scmp.lt.u32.totalorder %s945_s23, %s940_s20  ;;  %p949_p6 = scmp.lt.u32.totalorder %s940_s20, %s1141_s19 }
  0x2e   : > { %p943_p12 = pnand %p942_p11, %p941_p9 }
  0x2f   : > { %p948_p3 = por %p947_p2, %p946_p0 }
  0x30   : > { %p944_p13 = pneg %p943_p12 }
  0x31   : > { %p950_p10 = por %p949_p6, %p948_p3 }
  0x33   : > { %p951_p4 = pnand %p950_p10, %p944_p13 }
  0x35   : > { %954 = shalt.err (!%p951_p4)
}
  0x36   : > { %s955_s15 = scalar_lea.vmem %s1147_s27, 128  ;;  %s1011_s16 = smov [#allocation2]  }
  0x37   : > { %p956_p1 = scmp.ne.s32.totalorder %s1147_s27, %s955_s15  ;;  %s960_s11 = sshll.u32 %s1011_s16, 4  ;;  %s961_s11 = int_to_ptr.vmem [resolvable:$false] %s960_s11 }
  0x38   : > { %s962_s17 = scalar_lea.vmem %s961_s11, 256  ;;  %p963_p9 = scmp.lt.s32.totalorder %s1147_s27, %s961_s11 }
  0x39   : > { %p958_p5 = pnand %p956_p1, %p942_p11  ;;  %p964_p12 = scmp.lt.s32.totalorder %s962_s17, %s955_s15 }
  0x3b   : > { %p959_p8 = pneg %p958_p5  ;;  %p965_p0 = por %p964_p12, %p963_p9 }
  0x3d   : > { %p966_p2 = pnand %p965_p0, %p959_p8 }
  0x3f   : > { %969 = shalt.err (!%p966_p2)
}
  0x40   : > { %868 = dma.hbm_to_vmem [thread:$0]  (!%p1143_p7), %s1141_s19, 128, %s1147_s27, %s244_s14  }
  0x41   : > { %p1361_p13 = scmp.ne.s32.totalorder %s1355_s30, 0 }
  0x42   : > { %s265_s18 = sand.u32 (!%p1361_p13), 1, %s1000_s25   ;;  %p1362_p11 = scmp.ne.s32.totalorder (!%p1361_p13), %s1354_s29, 0 }
  0x43   : > { %263 = sbr.rel (%p1361_p13) target bundleno = 761 (0x2f9), region = 48  ;;  %s1177_s13 = sshll.u32 (!%p1361_p13), %s265_s18, 3 }
  0x44   : > { %s266_s20 = scalar_lea.sflag (!%p1361_p13), [#allocation3], %s265_s18  ;;  %s269_s21 = scalar_lea.vmem (!%p1361_p13), [#allocation2], %s1177_s13 }
  0x4a   : > { %987 = dma.done.wait (%p1362_p11), %s266_s20, 128  }
  0x4b   : > { %989 = vsyncadd (%p1362_p11), %s266_s20, 4294967168  ;;  %p1363_p3 = scmp.eq.s32.totalorder %s1074_s28, 0 }
  0x4d   : > { %991 = dma.done.wait (%p1363_p3), [#allocation5], 16   ;;  %p1364_p7 = pmov %p1363_p3 }
  0x4e   : > { %v1012_v0 = vmov 0.0|0.0   ;;  %vm1013_vm0 = vmmov 0   ;;  %v1014_v1 = vmov 0.0   ;;  %v308_v2 = vld [vmem:[%s1344_s1] sm:$0xff]  ;;  %v309_v3 = vld [vmem:[%s1344_s1 + $0x8] sm:$0xff]  ;;  %v310_v4 = vld [vmem:[%s1344_s1 + $0x10] sm:$0xff] }
  0x4f   : > { %993 = vsyncadd (%p1364_p7), [#allocation5], 4294967280  ;;  %801 = vmatprep.subr.bf16.mxu0 %v1012_v0  ;;  %728 = vmatprep.mubr.msk.f32.mxu0 %vm1013_vm0, %v1014_v1  ;;  %v802_v5 = vpack.c.bf16 %v309_v3, %v308_v2  ;;  %v311_v6 = vld [vmem:[%s1344_s1 + $0x18] sm:$0xff]  ;;  %v394_v7 = vld [vmem:[%s1346_s3] sm:$0xff]  ;;  %vm319_vm1 = vcmask 261120   ;;  %p303_p6 = scmp.lt.s32.totalorder %s1074_s28, 2 }
  0x50   : > { %807 = vmatprep.subr.bf16.mxu1 %v1012_v0  ;;  %763 = vmatprep.mubr.msk.f32.mxu1 %vm1013_vm0, %v1014_v1  ;;  %v395_v8 = vld [vmem:[%s1346_s3 + $0x8] sm:$0xff]  ;;  %v396_v9 = vld [vmem:[%s1346_s3 + $0x10] sm:$0xff]  ;;  %v397_v10 = vld [vmem:[%s1346_s3 + $0x18] sm:$0xff]  ;;  %v805_v11 = vpack.c.bf16 %v311_v6, %v310_v4  ;;  %vm587_vm2 = vcmask 130048  }
  0x51   : > { %803 = vmatpush3.bf16.msra.mxu0 %v802_v5  ;;  %v808_v12 = vpack.c.bf16 %v395_v8, %v394_v7  ;;  %v811_v13 = vpack.c.bf16 %v397_v10, %v396_v9  ;;  %v398_v14 = vld [vmem:[%s1346_s3 + $0x20] sm:$0xff]  ;;  %v399_v15 = vld [vmem:[%s1346_s3 + $0x28] sm:$0xff]  ;;  %v400_v18 = vld [vmem:[%s1346_s3 + $0x30] sm:$0xff]  ;;  %s1370_s28 = smov (!%p303_p6, %s1074_s28), 2 }
  0x52   : > { %804 = vmatprep.subr.bf16.mxu0 %v1012_v0  ;;  %v307_v16 = vld [vmem:[%s269_s21] sm:$0xff]  ;;  %v814_v17 = vpack.c.bf16 %v399_v15, %v398_v14  ;;  %v401_v19 = vld [vmem:[%s1346_s3 + $0x38] sm:$0xff]  ;;  %v404_v24 = vld [vmem:[%s1346_s3 + $0x50] sm:$0xff]  ;;  %s673_s22 = sshll.u32 %s1370_s28, 3 }
  0x53   : > { %809 = vmatpush3.bf16.msra.mxu1 %v808_v12  ;;  %v817_v20 = vpack.c.bf16 %v401_v19, %v400_v18  ;;  %v402_v21 = vld [vmem:[%s1346_s3 + $0x40] sm:$0xff]  ;;  %v403_v22 = vld [vmem:[%s1346_s3 + $0x48] sm:$0xff]  ;;  %v405_v25 = vld [vmem:[%s1346_s3 + $0x58] sm:$0xff]  ;;  %s306_s21 = scalar_lea.vmem %s1350_s7, %s673_s22 }
  0x54   : > { %810 = vmatprep.subr.bf16.mxu1 %v1012_v0  ;;  %v820_v23 = vpack.c.bf16 %v403_v22, %v402_v21  ;;  %v823_v26 = vpack.c.bf16 %v405_v25, %v404_v24  ;;  %v406_v27 = vld [vmem:[%s1346_s3 + $0x60] sm:$0xff]  ;;  %v407_v28 = vld [vmem:[%s1346_s3 + $0x68] sm:$0xff]  ;;  %v408_v30 = vld [vmem:[%s1346_s3 + $0x70] sm:$0xff] }
  0x55   : > { %806 = vmatpush3.bf16.msra.mxu0 %v805_v11  ;;  %v826_v29 = vpack.c.bf16 %v407_v28, %v406_v27  ;;  %v409_v31 = vld [vmem:[%s1346_s3 + $0x78] sm:$0xff]  ;;  %v488_v33 = vld [vmem:[%s1348_s5] sm:$0xff]  ;;  %v489_v34 = vld [vmem:[%s1348_s5 + $0x8] sm:$0xff] }
  0x56   : > { %831 = vmatprep.subr.bf16.mxu0 %v1012_v0  ;;  %v829_v32 = vpack.c.bf16 %v409_v31, %v408_v30  ;;  %v490_v35 = vld [vmem:[%s1348_s5 + $0x10] sm:$0xff]  ;;  %v832_v36 = vpack.c.bf16 %v489_v34, %v488_v33  ;;  %v491_v37 = vld [vmem:[%s1348_s5 + $0x18] sm:$0xff]  ;;  %v492_v39 = vld [vmem:[%s1348_s5 + $0x20] sm:$0xff] }
  0x57   : > { %812 = vmatpush3.bf16.msra.mxu1 %v811_v13  ;;  %v835_v38 = vpack.c.bf16 %v491_v37, %v490_v35  ;;  %v493_v40 = vld [vmem:[%s1348_s5 + $0x28] sm:$0xff]  ;;  %v494_v42 = vld [vmem:[%s1348_s5 + $0x30] sm:$0xff]  ;;  %v495_v43 = vld [vmem:[%s1348_s5 + $0x38] sm:$0xff] }
  0x58   : > { %729 = vmatmul.mubr.msk.f32.vlgmr.msra.gmra.mrb[0].mxu0 %vm319_vm1, %v307_v16  ;;  %813 = vmatprep.subr.bf16.mxu1 %v1012_v0  ;;  %v838_v41 = vpack.c.bf16 %v493_v40, %v492_v39  ;;  %v841_v44 = vpack.c.bf16 %v495_v43, %v494_v42  ;;  %v496_v45 = vld [vmem:[%s1348_s5 + $0x40] sm:$0xff]  ;;  %v497_v46 = vld [vmem:[%s1348_s5 + $0x48] sm:$0xff]  ;;  %v498_v48 = vld [vmem:[%s1348_s5 + $0x50] sm:$0xff] }
  0x59   : > { %798 = vmatprep.mubr.msk.f32.mxu0 %vm1013_vm0, %v1014_v1  ;;  %833 = vmatpush3.bf16.msra.mxu0 %v832_v36  ;;  %v844_v47 = vpack.c.bf16 %v497_v46, %v496_v45  ;;  %v499_v49 = vld [vmem:[%s1348_s5 + $0x58] sm:$0xff]  ;;  %v500_v51 = vld [vmem:[%s1348_s5 + $0x60] sm:$0xff]  ;;  %v501_v52 = vld [vmem:[%s1348_s5 + $0x68] sm:$0xff] }
  0x5a   : > { %834 = vmatprep.subr.bf16.mxu0 %v1012_v0  ;;  %v847_v50 = vpack.c.bf16 %v499_v49, %v498_v48  ;;  %v850_v53 = vpack.c.bf16 %v501_v52, %v500_v51  ;;  %v674_v54 = vld [vmem:[%s1345_s2] ss:$0 sm:$0xff]  ;;  %v502_v59 = vld [vmem:[%s1348_s5 + $0x70] sm:$0xff]  ;;  %v503_v60 = vld [vmem:[%s1348_s5 + $0x78] sm:$0xff] }
  0x5b   : > { %815 = vmatpush3.bf16.msra.mxu1 %v814_v17  ;;  %v853_v61 = vpack.c.bf16 %v503_v60, %v502_v59  ;;  %v676_v62 = vld [vmem:[%s1347_s4] ss:$0 sm:$0xff]  ;;  %v677_v3 = vld [vmem:[#allocation4] ss:$0 sm:$0xff] }
  0x5c   : > { %816 = vmatprep.subr.bf16.mxu1 %v1012_v0 }
  0x5d   : > { %836 = vmatpush3.bf16.msra.mxu0 %v835_v38 }
  0x5e   : > { %837 = vmatprep.subr.bf16.mxu0 %v1012_v0 }
  0x5f   : > { %818 = vmatpush3.bf16.msra.mxu1 %v817_v20 }
  0x60   : > { %819 = vmatprep.subr.bf16.mxu1 %v1012_v0 }
  0x61   : > { %839 = vmatpush3.bf16.msra.mxu0 %v838_v41 }
  0x62   : > { %840 = vmatprep.subr.bf16.mxu0 %v1012_v0 }
  0x63   : > { %821 = vmatpush3.bf16.msra.mxu1 %v820_v23 }
  0x64   : > { %822 = vmatprep.subr.bf16.mxu1 %v1012_v0 }
  0x65   : > { %842 = vmatpush3.bf16.msra.mxu0 %v841_v44 }
  0x66   : > { %843 = vmatprep.subr.bf16.mxu0 %v1012_v0 }
  0x67   : > { %824 = vmatpush3.bf16.msra.mxu1 %v823_v26 }
  0x68   : > { %825 = vmatprep.subr.bf16.mxu1 %v1012_v0 }
  0x69   : > { %845 = vmatpush3.bf16.msra.mxu0 %v844_v47 }
  0x6a   : > { %846 = vmatprep.subr.bf16.mxu0 %v1012_v0 }
  0x6b   : > { %827 = vmatpush3.bf16.msra.mxu1 %v826_v29 }
  0x6c   : > { %828 = vmatprep.subr.bf16.mxu1 %v1012_v0 }
  0x6d   : > { %848 = vmatpush3.bf16.msra.mxu0 %v847_v50 }
  0x6e   : > { %849 = vmatprep.subr.bf16.mxu0 %v1012_v0 }
  0x6f   : > { %830 = vmatpush3.bf16.msra.mxu1 %v829_v32 }
  0x71   : > { %851 = vmatpush3.bf16.msra.mxu0 %v850_v53 }
  0x72   : > { %852 = vmatprep.subr.bf16.mxu0 %v1012_v0 }
  0x75   : > { %854 = vmatpush3.bf16.msra.mxu0 %v853_v61 }
 0x12b   : > { %v389_v55 = vpop.f32.mrb[0].mxu0 }
 0x12c   : > { %v390_v56 = vadd.f32 %v674_v54, %v389_v55  ;;  %v730_v57 = vpop.f32.mrb[1].mxu0 }
 0x12e   : > { %v393_v58 = vmax.f32 %v390_v56, 0.0 }
 0x130   : > { %764 = vmatmul.mubr.f32.vlgmr.msra.gmra.mrb[0].mxu1 %v393_v58 }
 0x203   : > { %v483_v63 = vpop.f32.mrb[0].mxu1 }
 0x204   : > { %v484_v0 = vadd.f32 %v676_v62, %v483_v63  ;;  %v765_v1 = vpop.f32.mrb[1].mxu1 }
 0x206   : > { %v487_v2 = vmax.f32 %v484_v0, 0.0 }
 0x208   : > { %799 = vmatmul.mubr.f32.vlgmr.msra.gmra.mrb[2].mxu0 %v487_v2 }
 0x2db   : > { %v577_v4 = vpop.f32.mrb[2].mxu0 }
 0x2dc   : > { %v578_v5 = vadd.f32 %v677_v3, %v577_v4  ;;  %v800_v6 = vpop.f32.mrb[3].mxu0 }
 0x2de   : > { %v678_v7 = vmul.f32 -1.442695, %v578_v5 }
 0x2e0   : > { %908 = vpow2.f32 %v678_v7 }
 0x2ea   : > { %v909_v8 = vpop.eup %908 }
 0x2eb   : > { %v584_v9 = vadd.f32 1.0, %v909_v8 }
 0x2ed   : > { %910 = vrcp.f32 %v584_v9 }
 0x2f7   : > { %v911_v10 = vpop.eup %910 }
 0x2f8   : > { %588 = vst.msk [vmem:[%s306_s21] sm:$0xff] %vm587_vm2, %v911_v10 }
 0x2f9 PF: > { %p18_p10 = scmp.ge.s32.totalorder %s1093_s10, 5   ;;  %s1365_s24 = smov %s1000_s25 }
 0x2fa   : > { %s1366_s25 = smov %s1004_s26  ;;  %s1367_s26 = smov %s1129_s12 }
 0x2fb   : > { %s1368_s27 = smov %s1093_s10  ;;  %20 = sbr.rel (!%p18_p10) target bundleno = 4 (0x4), region = 92 }
 0x302   :  { %608 = vsyncpa [#allocation3], 1 }
 0x303   :  { %610 = vsyncpa [#allocation3 + $0x1], 1 }
 0x304   :  { %611 = vsyncpa [#allocation5], 1 }

</bundles_post_ra>
